<compile_context>
chip_gen: v6e
topology: v6e:2x2x1
jax: 0.10.0
libtpu: 0.0.40
codegen_flags: <defaults>
</compile_context>

<pallas_src>
import functools

import numpy as np

import jax
import jax.numpy as jnp
from jax import lax
from jax.experimental import pallas as pl
from jax.experimental.pallas import tpu as pltpu

BN_EPS = 1e-5
MAX_TILE_M = 1024     # upper bound on matmul rows per grid step
LANES = 128


def _round_up(v, m):
    return (v + m - 1) // m * m


def _vmem_limit_bytes(live_bytes):
    # Raise v5e's 16 MiB scoped default; stay well under v7x's 64 MiB physical.
    return int(min(max(2 * live_bytes, 32 * 1024 * 1024), 56 * 1024 * 1024))


# --------------------------------------------------------------------------- #
# Pallas kernels
# --------------------------------------------------------------------------- #
def _matmul_stats_kernel(a_ref, w_ref, acc_ref, stats_ref):
    """A[tile_m, K](bf16) @ W[K, Cp](bf16) -> bf16 acc + packed per-tile stats.

    Stats are computed from the f32 MXU accumulator (before the bf16 store):
    sublanes 0-3 of stats hold the per-column sum, sublanes 4-7 the sum of
    squares (packed into one lane-dense (8, Cp) store).
    """
    acc = jnp.dot(a_ref[...], w_ref[...], preferred_element_type=jnp.float32)
    acc_ref[...] = acc.astype(acc_ref.dtype)          # bf16 intermediate store
    s1 = jnp.sum(acc, axis=0, keepdims=True)          # (1, Cp) f32
    s2 = jnp.sum(acc * acc, axis=0, keepdims=True)    # (1, Cp) f32
    rows = lax.broadcasted_iota(jnp.int32, stats_ref.shape, 0)
    stats_ref[...] = jnp.where(rows < 4,
                               jnp.broadcast_to(s1, stats_ref.shape),
                               jnp.broadcast_to(s2, stats_ref.shape))


def _bn_relu_kernel(acc_ref, scale_ref, shift_ref, o_ref):
    """Per-tile finalize: y = max(scale * acc + shift, 0)  (BatchNorm + ReLU).

    acc is bf16 in HBM; upcast to f32 before the affine (no bf16 VALU on v5e).
    """
    y = acc_ref[...].astype(jnp.float32) * scale_ref[...] + shift_ref[...]
    o_ref[...] = jnp.maximum(y, 0.0).astype(o_ref.dtype)


# --------------------------------------------------------------------------- #
# Lowerings of ConvTranspose2d to a single matmul (wrapper-side layout glue)
# --------------------------------------------------------------------------- #
def _subpixel_lowering(x_nhwc_bf16, weight_pt, s, p):
    """Fast path: output = pixel-shuffle of a stride-1 conv over the raw input.

    Returns A (M, K) bf16 and W (K, s*s*Cout) f32 such that
      (A @ W)[(n,uy,ux), (dy,dx,o)] == ConvTranspose2d(x)[n, o, uy*s+dy, ux*s+dx].
    Valid whenever Ho % s == 0 and Wo % s == 0.
    """
    N, H, W_, Cin = x_nhwc_bf16.shape
    _, Cout, kH, kW = weight_pt.shape
    Ho = (H - 1) * s - 2 * p + kH
    Wo = (W_ - 1) * s - 2 * p + kW
    Uy, Ux = Ho // s, Wo // s
    e_hi_h = (kH - 1 - p) // s
    e_hi_w = (kW - 1 - p) // s
    e_lo = -((s - 1 + p) // s)
    Th = e_hi_h - e_lo + 1
    Tw = e_hi_w - e_lo + 1

    xp = jnp.pad(
        x_nhwc_bf16,
        ((0, 0),
         (e_hi_h, max(0, Uy - e_lo - H)),
         (e_hi_w, max(0, Ux - e_lo - W_)),
         (0, 0)))

    cols = []
    for jy in range(Th):
        for jx in range(Tw):
            cols.append(xp[:, jy:jy + Uy, jx:jx + Ux, :])        # (N, Uy, Ux, Cin) bf16
    patches = jnp.stack(cols, axis=3)                            # (N, Uy, Ux, Th*Tw, Cin)
    a_mat = patches.reshape(N * Uy * Ux, Th * Tw * Cin)          # bf16

    # Trace-time numpy index map: (jy, jx, dy, dx) -> kernel tap ay*kW+ax,
    # or kH*kW for "zero tap".  One gather replaces the old nested scatters.
    idx = np.full((Th, Tw, s, s), kH * kW, dtype=np.int32)
    for jy in range(Th):
        for dy in range(s):
            ay = (e_hi_h - jy) * s + dy + p
            if not 0 <= ay < kH:
                continue
            for jx in range(Tw):
                for dx in range(s):
                    ax = (e_hi_w - jx) * s + dx + p
                    if 0 <= ax < kW:
                        idx[jy, jx, dy, dx] = ay * kW + ax

    w_taps = jnp.transpose(weight_pt.astype(jnp.float32),
                           (2, 3, 0, 1)).reshape(kH * kW, Cin, Cout)
    w_taps = jnp.concatenate(
        [w_taps, jnp.zeros((1, Cin, Cout), jnp.float32)], axis=0)
    w_uni = jnp.take(w_taps, jnp.asarray(idx.reshape(-1)), axis=0)  # (Th*Tw*s*s, Cin, Cout)
    w_uni = w_uni.reshape(Th, Tw, s, s, Cin, Cout).transpose(0, 1, 4, 2, 3, 5)
    w_mat = w_uni.reshape(Th * Tw * Cin, s * s * Cout)
    return a_mat, w_mat, s * s


def _dilated_im2col_lowering(x_nhwc_bf16, weight_pt, s, p):
    """Fallback: stride-dilate + pad + im2col (general but does zero-mult work)."""
    N, H, W_, Cin = x_nhwc_bf16.shape
    _, Cout, kH, kW = weight_pt.shape
    Ho = (H - 1) * s - 2 * p + kH
    Wo = (W_ - 1) * s - 2 * p + kW
    Hd, Wd = (H - 1) * s + 1, (W_ - 1) * s + 1
    xd = jnp.zeros((N, Hd, Wd, Cin), jnp.bfloat16).at[:, ::s, ::s, :].set(x_nhwc_bf16)
    xp = jnp.pad(xd, ((0, 0), (kH - 1 - p,) * 2, (kW - 1 - p,) * 2, (0, 0)))
    cols = []
    for a in range(kH):
        for b in range(kW):
            cols.append(xp[:, a:a + Ho, b:b + Wo, :])            # (N, Ho, Wo, Cin) bf16
    patches = jnp.stack(cols, axis=3)                            # (N, Ho, Wo, kH*kW, Cin)
    a_mat = patches.reshape(N * Ho * Wo, kH * kW * Cin)          # bf16
    w_conv = jnp.transpose(jnp.flip(weight_pt, axis=(2, 3)), (2, 3, 0, 1))
    w_mat = w_conv.reshape(kH * kW * Cin, Cout).astype(jnp.float32)
    return a_mat, w_mat, 1


# --------------------------------------------------------------------------- #
# Forward pass: ConvTranspose2d + BatchNorm2d(training) + ReLU
# --------------------------------------------------------------------------- #
@functools.partial(jax.jit, static_argnames=("stride", "padding"))
def deconv2d_batchnorm_relu(x_nchw, weight_pt, bias, gamma, beta, *, stride, padding):
    # bias cancels exactly: training-mode BN subtracts the per-channel batch
    # mean, which contains the bias.
    del bias
    N, Cin, H, W = x_nchw.shape
    _, Cout, kH, kW = weight_pt.shape
    s, p = int(stride), int(padding)
    Ho = (H - 1) * s - 2 * p + kH
    Wo = (W - 1) * s - 2 * p + kW
    assert kH - 1 - p >= 0 and kW - 1 - p >= 0, "padding > k-1 not supported"

    x = jnp.transpose(x_nchw, (0, 2, 3, 1)).astype(jnp.bfloat16)   # NHWC bf16

    fast = (Ho % s == 0) and (Wo % s == 0)
    if fast:
        a_mat, w_mat, rep = _subpixel_lowering(x, weight_pt, s, p)
    else:
        a_mat, w_mat, rep = _dilated_im2col_lowering(x, weight_pt, s, p)

    m_rows, K = a_mat.shape
    c_block = w_mat.shape[1]                     # rep * Cout
    c_pad = _round_up(c_block, LANES)            # lane-dense output width

    # Tile selection: as large as possible (fewer pipeline bubbles, denser
    # DMAs) but at least 2 tiles so v7x's two TensorCores both get work, and
    # small enough that double-buffered blocks stay comfortably inside VMEM.
    tile_m = min(MAX_TILE_M, max(8, _round_up(-(-m_rows // 2), 8)))

    def _pass1_live(tm):
        return (2 * tm * K * 2            # A tile (bf16, double-buffered)
                + 2 * K * c_pad * 2       # resident weight block
                + 2 * tm * c_pad * 2      # bf16 acc out (double-buffered)
                + 2 * 8 * c_pad * 4)      # packed stats out

    while tile_m > 256 and _pass1_live(tile_m) > 48 * 1024 * 1024:
        tile_m = max(256, _round_up(tile_m // 2, 8))

    n_tiles = int(pl.cdiv(m_rows, tile_m))
    m_pad = n_tiles * tile_m

    # bf16 MXU inputs (f32 accumulation inside the kernel keeps BN numerics).
    a_pad = jnp.pad(a_mat, ((0, m_pad - m_rows), (0, 0)))
    w_pad = jnp.pad(w_mat.astype(jnp.bfloat16), ((0, 0), (0, c_pad - c_block)))

    # ---- Pass 1: tiled matmul + packed per-tile BN partial sums --------------
    acc, stats = pl.pallas_call(
        _matmul_stats_kernel,
        grid=(n_tiles,),
        in_specs=[
            pl.BlockSpec((tile_m, K), lambda i: (i, 0)),
            pl.BlockSpec((K, c_pad), lambda i: (0, 0)),      # weights stay resident
        ],
        out_specs=[
            pl.BlockSpec((tile_m, c_pad), lambda i: (i, 0)),
            pl.BlockSpec((8, c_pad), lambda i: (i, 0)),
        ],
        out_shape=[
            jax.ShapeDtypeStruct((m_pad, c_pad), jnp.bfloat16),   # bf16 intermediate
            jax.ShapeDtypeStruct((n_tiles * 8, c_pad), jnp.float32),
        ],
        compiler_params=pltpu.CompilerParams(
            dimension_semantics=("parallel",),
            vmem_limit_bytes=_vmem_limit_bytes(_pass1_live(tile_m))),
        cost_estimate=pl.CostEstimate(
            flops=2 * m_pad * K * c_pad,
            transcendentals=0,
            bytes_accessed=(m_pad * K * 2 + K * c_pad * 2
                            + m_pad * c_pad * 2 + n_tiles * 8 * c_pad * 4)),
    )(a_pad, w_pad)

    # ---- BN batch statistics (tiny wrapper reduction over tiles) -------------
    stats = stats.reshape(n_tiles, 8, c_pad)
    col_sum = jnp.sum(stats[:, 0, :], axis=0)            # sum   (sublanes 0-3)
    col_sq = jnp.sum(stats[:, 4, :], axis=0)             # sumsq (sublanes 4-7)
    ch_sum = col_sum[:c_block].reshape(rep, Cout).sum(axis=0)
    ch_sq = col_sq[:c_block].reshape(rep, Cout).sum(axis=0)
    cnt = float(N * Ho * Wo)                              # true element count per channel
    mean = ch_sum / cnt
    # NOTE: E[x^2]-E[x]^2 from f32 partial sums; fine at these scales.
    var = jnp.maximum(ch_sq / cnt - mean * mean, 0.0)
    inv_std = lax.rsqrt(var + BN_EPS)
    scale_c = gamma.astype(jnp.float32) * inv_std
    shift_c = beta.astype(jnp.float32) - scale_c * mean
    scale_cols = jnp.pad(jnp.tile(scale_c, rep), (0, c_pad - c_block)).reshape(1, c_pad)
    shift_cols = jnp.pad(jnp.tile(shift_c, rep), (0, c_pad - c_block)).reshape(1, c_pad)

    # ---- Pass 2: tiled normalize + ReLU --------------------------------------
    p2_live = 2 * tile_m * c_pad * 2 + 2 * tile_m * c_pad * 4 + 4 * c_pad * 4
    y_full = pl.pallas_call(
        _bn_relu_kernel,
        grid=(n_tiles,),
        in_specs=[
            pl.BlockSpec((tile_m, c_pad), lambda i: (i, 0)),
            pl.BlockSpec((1, c_pad), lambda i: (0, 0)),
            pl.BlockSpec((1, c_pad), lambda i: (0, 0)),
        ],
        out_specs=pl.BlockSpec((tile_m, c_pad), lambda i: (i, 0)),
        out_shape=jax.ShapeDtypeStruct((m_pad, c_pad), jnp.float32),
        compiler_params=pltpu.CompilerParams(
            dimension_semantics=("parallel",),
            vmem_limit_bytes=_vmem_limit_bytes(p2_live)),
        cost_estimate=pl.CostEstimate(
            flops=2 * m_pad * c_pad,
            transcendentals=0,
            bytes_accessed=m_pad * c_pad * 2 + m_pad * c_pad * 4),
    )(acc, scale_cols, shift_cols)

    # ---- reassemble to NCHW (pure XLA layout ops) ----------------------------
    if fast:
        Uy, Ux = Ho // s, Wo // s
        y = y_full[:m_rows, :c_block].reshape(N, Uy, Ux, s, s, Cout)
        y = y.transpose(0, 1, 3, 2, 4, 5).reshape(N, Ho, Wo, Cout)
    else:
        y = y_full[:m_rows, :Cout].reshape(N, Ho, Wo, Cout)
    return jnp.transpose(y, (0, 3, 1, 2))


# --------------------------------------------------------------------------- #
# Pure-JAX reference (lax dilated conv == ConvTranspose2d, then BN + ReLU)
# --------------------------------------------------------------------------- #
def _reference(x_nchw, weight_pt, bias, gamma, beta, stride, padding):
    N, Cin, H, W = x_nchw.shape
    _, Cout, kH, kW = weight_pt.shape
    s, p = int(stride), int(padding)
    w_oihw = jnp.transpose(jnp.flip(weight_pt, axis=(2, 3)), (1, 0, 2, 3))
    dn = lax.conv_dimension_numbers(x_nchw.shape, w_oihw.shape,
                                    ("NCHW", "OIHW", "NCHW"))
    y = lax.conv_general_dilated(
        x_nchw, w_oihw, window_strides=(1, 1),
        padding=[(kH - 1 - p, kH - 1 - p), (kW - 1 - p, kW - 1 - p)],
        lhs_dilation=(s, s), rhs_dilation=(1, 1), dimension_numbers=dn)
    y = y + bias.reshape(1, Cout, 1, 1)
    mean = jnp.mean(y, axis=(0, 2, 3), keepdims=True)
    var = jnp.mean((y - mean) ** 2, axis=(0, 2, 3), keepdims=True)
    y = (gamma.reshape(1, Cout, 1, 1) * (y - mean) * lax.rsqrt(var + BN_EPS)
         + beta.reshape(1, Cout, 1, 1))
    return jnp.maximum(y, 0.0)


if __name__ == "__main__":
    def _run_case(N, Cin, H, W, Cout, k_size, stride, padding):
        key = jax.random.PRNGKey(0)
        kx, kw, kb, kg, kbt = jax.random.split(key, 5)
        x = jax.random.normal(kx, (N, Cin, H, W), jnp.float32)
        weight = jax.random.normal(kw, (Cin, Cout, k_size, k_size), jnp.float32) * 0.1
        bias = jax.random.normal(kb, (Cout,), jnp.float32) * 0.1
        gamma = 1.0 + jax.random.normal(kg, (Cout,), jnp.float32) * 0.1
        beta = jax.random.normal(kbt, (Cout,), jnp.float32) * 0.1

        out = deconv2d_batchnorm_relu(x, weight, bias, gamma, beta,
                                      stride=stride, padding=padding)
        out = jax.block_until_ready(out)

        Ho = (H - 1) * stride - 2 * padding + k_size
        Wo = (W - 1) * stride - 2 * padding + k_size
        assert out.shape == (N, Cout, Ho, Wo), out.shape

        ref = _reference(x, weight, bias, gamma, beta, stride, padding)
        err = float(jnp.max(jnp.abs(out - ref)))
        # bf16 MXU inputs + bf16 acc intermediate (f32 stats/affine) vs f32 ref.
        assert err < 5e-2, err

    # deconv2DBatchNormRelu(in_channels=4, n_filters=8, k_size=4, stride=2,
    #                       padding=1, bias=True)  -> sub-pixel fast path.
    _run_case(N=2, Cin=4, H=16, W=16, Cout=8, k_size=4, stride=2, padding=1)
    # Non-divisible output phase (k=3, s=2, p=0) -> exercises the fallback path.
    _run_case(N=2, Cin=4, H=8, W=8, Cout=8, k_size=3, stride=2, padding=0)

    print("KERNEL_OK")
</pallas_src>

<mosaic_0001>
module attributes {stable_mosaic.version = 11 : i64} {
  func.func @_matmul_stats_kernel(%arg0: i32, %arg1: memref<256x36xbf16, #tpu.memory_space<vmem>>, %arg2: memref<36x128xbf16, #tpu.memory_space<vmem>>, %arg3: memref<256x128xbf16, #tpu.memory_space<vmem>>, %arg4: memref<8x128xf32, #tpu.memory_space<vmem>>) attributes {dimension_semantics = [#tpu.dimension_semantics<parallel>], iteration_bounds = array<i64: 2>, scalar_prefetch = 0 : i64, scratch_operands = 0 : i64, tpu.core_type = #tpu.core_type<tc>, window_params = [{transform_indices = @transform_0, window_bounds = array<i64: 256, 36>}, {pipeline_mode = #tpu.pipeline_mode<synchronous>, transform_indices = @transform_1, window_bounds = array<i64: 36, 128>}, {transform_indices = @transform_2, window_bounds = array<i64: 256, 128>}, {transform_indices = @transform_3, window_bounds = array<i64: 8, 128>}]} {
    %c0 = arith.constant 0 : index
    %c0_0 = arith.constant 0 : index
    %0 = vector.load %arg1[%c0, %c0_0] : memref<256x36xbf16, #tpu.memory_space<vmem>>, vector<256x36xbf16>
    %c0_1 = arith.constant 0 : index
    %c0_2 = arith.constant 0 : index
    %1 = vector.load %arg2[%c0_1, %c0_2] : memref<36x128xbf16, #tpu.memory_space<vmem>>, vector<36x128xbf16>
    %cst = arith.constant dense<0.000000e+00> : vector<256x128xf32>
    %2 = tpu.matmul %0, %1, %cst {dimension_numbers = #tpu.dot_dimension_numbers<[1], [0], [0], [1], [0, 0, 1, 1], [], []>} : vector<256x36xbf16>, vector<36x128xbf16>, vector<256x128xf32> -> vector<256x128xf32>
    %3 = arith.truncf %2 : vector<256x128xf32> to vector<256x128xbf16>
    %c0_3 = arith.constant 0 : index
    %c0_4 = arith.constant 0 : index
    %4 = vector.load %arg3[%c0_3, %c0_4] : memref<256x128xbf16, #tpu.memory_space<vmem>>, vector<256x128xbf16>
    tpu.vector_store %arg3[%c0_3, %c0_4], %3 {strides = array<i32>} : memref<256x128xbf16, #tpu.memory_space<vmem>>, vector<256x128xbf16>,
    %cst_5 = arith.constant dense<0.000000e+00> : vector<128xf32>
    %5 = vector.multi_reduction <add>, %2, %cst_5 [0] : vector<256x128xf32> to vector<128xf32>
    %6 = vector.shape_cast %5 : vector<128xf32> to vector<1x128xf32>
    %7 = arith.mulf %2, %2 : vector<256x128xf32>
    %cst_6 = arith.constant dense<0.000000e+00> : vector<128xf32>
    %8 = vector.multi_reduction <add>, %7, %cst_6 [0] : vector<256x128xf32> to vector<128xf32>
    %9 = vector.shape_cast %8 : vector<128xf32> to vector<1x128xf32>
    %10 = tpu.iota {dimensions = array<i32: 0>} : vector<8x128xi32>
    %c4_i32 = arith.constant 4 : i32
    %11 = vector.broadcast %c4_i32 : i32 to vector<8x128xi32>
    %12 = arith.cmpi slt, %10, %11 : vector<8x128xi32>
    %13 = vector.shape_cast %6 : vector<1x128xf32> to vector<1x128xf32>
    %14 = vector.broadcast %13 : vector<1x128xf32> to vector<8x128xf32>
    %15 = vector.shape_cast %9 : vector<1x128xf32> to vector<1x128xf32>
    %16 = vector.broadcast %15 : vector<1x128xf32> to vector<8x128xf32>
    %17 = arith.select %12, %14, %16 : vector<8x128xi1>, vector<8x128xf32>
    %c0_7 = arith.constant 0 : index
    %c0_8 = arith.constant 0 : index
    %18 = vector.load %arg4[%c0_7, %c0_8] : memref<8x128xf32, #tpu.memory_space<vmem>>, vector<8x128xf32>
    tpu.vector_store %arg4[%c0_7, %c0_8], %17 {strides = array<i32>} : memref<8x128xf32, #tpu.memory_space<vmem>>, vector<8x128xf32>,
    return
  }
  func.func @transform_0(%arg0: i32) -> (i32, i32) {
    %c0_i32 = arith.constant 0 : i32
    %c0_i32_0 = arith.constant 0 : i32
    return %arg0, %c0_i32 : i32, i32
  }
  func.func @transform_1(%arg0: i32) -> (i32, i32) {
    %c0_i32 = arith.constant 0 : i32
    %c0_i32_0 = arith.constant 0 : i32
    %c0_i32_1 = arith.constant 0 : i32
    return %c0_i32, %c0_i32_0 : i32, i32
  }
  func.func @transform_2(%arg0: i32) -> (i32, i32) {
    %c0_i32 = arith.constant 0 : i32
    %c0_i32_0 = arith.constant 0 : i32
    return %arg0, %c0_i32 : i32, i32
  }
  func.func @transform_3(%arg0: i32) -> (i32, i32) {
    %c0_i32 = arith.constant 0 : i32
    %c0_i32_0 = arith.constant 0 : i32
    return %arg0, %c0_i32 : i32, i32
  }
}

module attributes {stable_mosaic.version = 11 : i64} {
  func.func @_bn_relu_kernel(%arg0: i32, %arg1: memref<256x128xbf16, #tpu.memory_space<vmem>>, %arg2: memref<1x128xf32, #tpu.memory_space<vmem>>, %arg3: memref<1x128xf32, #tpu.memory_space<vmem>>, %arg4: memref<256x128xf32, #tpu.memory_space<vmem>>) attributes {dimension_semantics = [#tpu.dimension_semantics<parallel>], iteration_bounds = array<i64: 2>, scalar_prefetch = 0 : i64, scratch_operands = 0 : i64, tpu.core_type = #tpu.core_type<tc>, window_params = [{transform_indices = @transform_0, window_bounds = array<i64: 256, 128>}, {pipeline_mode = #tpu.pipeline_mode<synchronous>, transform_indices = @transform_1, window_bounds = array<i64: 1, 128>}, {pipeline_mode = #tpu.pipeline_mode<synchronous>, transform_indices = @transform_2, window_bounds = array<i64: 1, 128>}, {transform_indices = @transform_3, window_bounds = array<i64: 256, 128>}]} {
    %c0 = arith.constant 0 : index
    %c0_0 = arith.constant 0 : index
    %0 = vector.load %arg1[%c0, %c0_0] : memref<256x128xbf16, #tpu.memory_space<vmem>>, vector<256x128xbf16>
    %1 = arith.extf %0 : vector<256x128xbf16> to vector<256x128xf32>
    %c0_1 = arith.constant 0 : index
    %c0_2 = arith.constant 0 : index
    %2 = vector.load %arg2[%c0_1, %c0_2] : memref<1x128xf32, #tpu.memory_space<vmem>>, vector<1x128xf32>
    %3 = vector.broadcast %2 : vector<1x128xf32> to vector<256x128xf32>
    %4 = arith.mulf %1, %3 : vector<256x128xf32>
    %c0_3 = arith.constant 0 : index
    %c0_4 = arith.constant 0 : index
    %5 = vector.load %arg3[%c0_3, %c0_4] : memref<1x128xf32, #tpu.memory_space<vmem>>, vector<1x128xf32>
    %6 = vector.broadcast %5 : vector<1x128xf32> to vector<256x128xf32>
    %7 = arith.addf %4, %6 : vector<256x128xf32>
    %cst = arith.constant 0.000000e+00 : f32
    %8 = vector.broadcast %cst : f32 to vector<256x128xf32>
    %9 = arith.maximumf %7, %8 : vector<256x128xf32>
    %c0_5 = arith.constant 0 : index
    %c0_6 = arith.constant 0 : index
    %10 = vector.load %arg4[%c0_5, %c0_6] : memref<256x128xf32, #tpu.memory_space<vmem>>, vector<256x128xf32>
    tpu.vector_store %arg4[%c0_5, %c0_6], %9 {strides = array<i32>} : memref<256x128xf32, #tpu.memory_space<vmem>>, vector<256x128xf32>,
    return
  }
  func.func @transform_0(%arg0: i32) -> (i32, i32) {
    %c0_i32 = arith.constant 0 : i32
    %c0_i32_0 = arith.constant 0 : i32
    return %arg0, %c0_i32 : i32, i32
  }
  func.func @transform_1(%arg0: i32) -> (i32, i32) {
    %c0_i32 = arith.constant 0 : i32
    %c0_i32_0 = arith.constant 0 : i32
    %c0_i32_1 = arith.constant 0 : i32
    return %c0_i32, %c0_i32_0 : i32, i32
  }
  func.func @transform_2(%arg0: i32) -> (i32, i32) {
    %c0_i32 = arith.constant 0 : i32
    %c0_i32_0 = arith.constant 0 : i32
    %c0_i32_1 = arith.constant 0 : i32
    return %c0_i32, %c0_i32_0 : i32, i32
  }
  func.func @transform_3(%arg0: i32) -> (i32, i32) {
    %c0_i32 = arith.constant 0 : i32
    %c0_i32_0 = arith.constant 0 : i32
    return %arg0, %c0_i32 : i32, i32
  }
}

</mosaic_0001>

<bundles_post_ra>
// kernel: tile.18
= control target key start
LH: loop header
LB: loop body
LE: loop exit
PB: predicated region body
PF: predicated region fallthrough
CT: control target
= control target key end

     0   :  { %s22_s0 = inlined_call_operand.vmem [shape: f32[8], index: 0, kind: input, shape index: {}]   ;;  %s23_s1 = inlined_call_operand.vmem [shape: f32[4,8], index: 1, kind: output, shape index: {}]  }
   0x1   :  { %v4_v0 = vld [vmem:[%s22_s0] ss:$0 sm:$0xff] }
   0x2   :  { %5 = vst [vmem:[%s23_s1] sm:$0xf] %v4_v0 }

// kernel: tile.19
= control target key start
LH: loop header
LB: loop body
LE: loop exit
PB: predicated region body
PF: predicated region fallthrough
CT: control target
= control target key end

     0   :  { %vm8_vm0 = vcmask 64512   ;;  %s40_s8 = smov 8   ;;  %s41_s9 = smov 16   ;;  %vm14_vm1 = vcmask 261312   ;;  %vm20_vm2 = vcmask 195712   ;;  %vm26_vm3 = vcmask 130112   ;;  %s58_s0 = inlined_call_operand.vmem [shape: f32[4,8], index: 0, kind: input, shape index: {}]   ;;  %s59_s1 = inlined_call_operand.vmem [shape: f32[32], index: 1, kind: output, shape index: {}]  }
   0x1   :  { %v5_v0 = vld [vmem:[%s58_s0] sm:$0xf]  ;;  %s39_s0 = smov 24  }
   0x2   :  { %6 = vst [vmem:[#allocation1] sm:$0xf] %v5_v0 }
   0x9   :  { %v11_v1 = vld [vmem:[#allocation1 + $0x3] sm:$0x1]   ;;  %v23_v2 = vld [vmem:[#allocation1 + $0x1] sm:$0x1]   ;;  %v7_v3 = vld [vmem:[#allocation1] sm:$0x1]  }
   0xa   :  { %12 = vrot.lane.b32.xlu0 %v11_v1, %s39_s0  ;;  %24 = vrot.lane.b32.xlu1 %v23_v2, %s40_s8  ;;  %v17_v4 = vld [vmem:[#allocation1 + $0x2] sm:$0x1]   ;;  %9 = vst.msk [vmem:[#allocation0] sm:$0x1] %vm8_vm0, %v7_v3  }
   0xe   :  { %18 = vrot.lane.b32.xlu0 %v17_v4, %s41_s9 }
  0x7c   :  { %v13_v5 = vpop.permute.xlu0 %12   ;;  %v25_v6 = vpop.permute.xlu1 %24  }
  0x7d   :  { %15 = vst.msk [vmem:[#allocation0] sm:$0x1] %vm14_vm1, %v13_v5  }
  0x80   :  { %v19_v7 = vpop.permute.xlu0 %18  }
  0x81   :  { %21 = vst.msk [vmem:[#allocation0] sm:$0x1] %vm20_vm2, %v19_v7  }
  0x82   :  { %27 = vst.msk [vmem:[#allocation0] sm:$0x1] %vm26_vm3, %v25_v6  }
  0x89   :  { %v32_v8 = vld [vmem:[#allocation0] sm:$0x1] }
  0x8a   :  { %35 = vst [vmem:[%s59_s1] sm:$0x1] %v32_v8 }

// kernel: deconv2d_batchnorm_relu.3
= control target key start
LH: loop header
LB: loop body
LE: loop exit
PB: predicated region body
PF: predicated region fallthrough
CT: control target
= control target key end

     0   :  { %s564_s12 = smov 0   ;;  %s711_s0 = inlined_call_operand.vmem [shape: bf16[512,128], index: 0, kind: input, shape index: {}]   ;;  %s712_s1 = inlined_call_operand.vmem [shape: f32[1,128], index: 1, kind: input, shape index: {}]   ;;  %s713_s2 = inlined_call_operand.vmem [shape: f32[1,128], index: 2, kind: input, shape index: {}]   ;;  %s714_s3 = inlined_call_operand.vmem [shape: f32[512,128], index: 3, kind: output, shape index: {}]  }
   0x1 LB: > { %s436_s13 = sadd.s32 4294967295, %s542_s12   ;;  %p440_p0 = scmp.ge.s32.totalorder %s542_s12, 1  ;;  %s542_s12 = sphi %s564_s12, %s13_s12  }
   0x2   : > { %p138_p1 = scmp.lt.s32.totalorder %s542_s12, 3 }
   0x4   : > { %p139_p2 = pnand %p440_p0, %p138_p1 }
   0x5   : > { %s441_s14 = sshll.u32 (!%p139_p2), %s436_s13, 5 }
   0x6   : > { %142 = sbr.rel (%p139_p2) target bundleno = 51 (0x33), region = 32  ;;  %p163_p3 = scmp.lt.s32.totalorder (!%p139_p2), %s441_s14, 63 }
   0xb   : > { %s716_s14 = smov (!%p163_p3, %s441_s14), 63  ;;  %v583_v0 = vld [vmem:[%s712_s1] ss:$0 sm:$0xff] }
   0xc   : > { %s442_s15 = sshll.u32 %s716_s14, 2  ;;  %v592_v9 = vld [vmem:[%s713_s2] ss:$0 sm:$0xff]  ;;  %s444_s23 = sshll.u32 %s716_s14, 3 }
   0xd   : > { %s578_s18 = scalar_lea.vmem %s711_s0, %s442_s15  ;;  %s610_s26 = scalar_lea.vmem %s714_s3, %s444_s23 }
   0xe   : > { %v450_v1 = vld [vmem:[%s578_s18] sm:$0xff]   ;;  %v513_v2 = vld [vmem:[%s578_s18 + $0x8] sm:$0xff]   ;;  %v514_v3 = vld [vmem:[%s578_s18 + $0x10] sm:$0xff]  }
   0xf   : > { %v451_v4 = vunpack.c.l.bf16 %v450_v1  ;;  %v452_v5 = vunpack.c.h.bf16 %v450_v1  ;;  %v455_v6 = vunpack.c.l.bf16 %v513_v2  ;;  %v456_v7 = vunpack.c.h.bf16 %v513_v2  ;;  %v515_v8 = vld [vmem:[%s578_s18 + $0x18] sm:$0xff]   ;;  %v516_v30 = vld [vmem:[%s578_s18 + $0x20] sm:$0xff]   ;;  %v517_v31 = vld [vmem:[%s578_s18 + $0x28] sm:$0xff]  }
  0x10   : > { %v459_v10 = vunpack.c.l.bf16 %v514_v3  ;;  %v460_v11 = vunpack.c.h.bf16 %v514_v3  ;;  %v463_v12 = vunpack.c.l.bf16 %v515_v8  ;;  %v464_v13 = vunpack.c.h.bf16 %v515_v8  ;;  %v518_v36 = vld [vmem:[%s578_s18 + $0x30] sm:$0xff]   ;;  %v519_v37 = vld [vmem:[%s578_s18 + $0x38] sm:$0xff]   ;;  %v520_v3 = vld [vmem:[%s578_s18 + $0x40] sm:$0xff]  }
  0x11   : > { %v245_v14 = vmul.f32 %v451_v4, %v583_v0  ;;  %v246_v15 = vmul.f32 %v452_v5, %v583_v0  ;;  %v247_v16 = vmul.f32 %v455_v6, %v583_v0  ;;  %v248_v17 = vmul.f32 %v456_v7, %v583_v0  ;;  %v521_v4 = vld [vmem:[%s578_s18 + $0x48] sm:$0xff]  }
  0x12   : > { %v249_v18 = vmul.f32 %v459_v10, %v583_v0  ;;  %v250_v19 = vmul.f32 %v460_v11, %v583_v0  ;;  %v251_v20 = vmul.f32 %v463_v12, %v583_v0  ;;  %v252_v21 = vmul.f32 %v464_v13, %v583_v0  ;;  %v522_v10 = vld [vmem:[%s578_s18 + $0x50] sm:$0xff]   ;;  %v523_v11 = vld [vmem:[%s578_s18 + $0x58] sm:$0xff]  }
  0x13   : > { %v284_v22 = vadd.f32 %v592_v9, %v245_v14  ;;  %v285_v23 = vadd.f32 %v592_v9, %v246_v15  ;;  %v286_v24 = vadd.f32 %v592_v9, %v247_v16  ;;  %v287_v25 = vadd.f32 %v592_v9, %v248_v17 }
  0x14   : > { %v288_v26 = vadd.f32 %v592_v9, %v249_v18  ;;  %v289_v27 = vadd.f32 %v592_v9, %v250_v19  ;;  %v290_v28 = vadd.f32 %v592_v9, %v251_v20  ;;  %v291_v29 = vadd.f32 %v592_v9, %v252_v21 }
  0x15   : > { %v316_v32 = vmax.f32 %v284_v22, 0.0  ;;  %v317_v33 = vmax.f32 %v285_v23, 0.0  ;;  %v318_v34 = vmax.f32 %v286_v24, 0.0  ;;  %v319_v35 = vmax.f32 %v287_v25, 0.0 }
  0x16   : > { %v320_v38 = vmax.f32 %v288_v26, 0.0  ;;  %v321_v39 = vmax.f32 %v289_v27, 0.0  ;;  %v322_v40 = vmax.f32 %v290_v28, 0.0  ;;  %v323_v41 = vmax.f32 %v291_v29, 0.0 }
  0x17   : > { %348 = vst [vmem:[%s610_s26] sm:$0xff] %v316_v32  ;;  %349 = vst [vmem:[%s610_s26 + $0x8] sm:$0xff] %v317_v33  ;;  %v467_v42 = vunpack.c.l.bf16 %v516_v30  ;;  %v468_v43 = vunpack.c.h.bf16 %v516_v30  ;;  %v471_v44 = vunpack.c.l.bf16 %v517_v31  ;;  %v472_v45 = vunpack.c.h.bf16 %v517_v31 }
  0x18   : > { %350 = vst [vmem:[%s610_s26 + $0x10] sm:$0xff] %v318_v34  ;;  %351 = vst [vmem:[%s610_s26 + $0x18] sm:$0xff] %v319_v35  ;;  %v475_v46 = vunpack.c.l.bf16 %v518_v36  ;;  %v476_v47 = vunpack.c.h.bf16 %v518_v36  ;;  %v479_v48 = vunpack.c.l.bf16 %v519_v37  ;;  %v480_v49 = vunpack.c.h.bf16 %v519_v37 }
  0x19   : > { %352 = vst [vmem:[%s610_s26 + $0x20] sm:$0xff] %v320_v38  ;;  %353 = vst [vmem:[%s610_s26 + $0x28] sm:$0xff] %v321_v39  ;;  %v253_v50 = vmul.f32 %v467_v42, %v583_v0  ;;  %v254_v51 = vmul.f32 %v468_v43, %v583_v0  ;;  %v255_v52 = vmul.f32 %v471_v44, %v583_v0  ;;  %v483_v16 = vunpack.c.l.bf16 %v520_v3 }
  0x1a   : > { %354 = vst [vmem:[%s610_s26 + $0x30] sm:$0xff] %v322_v40  ;;  %355 = vst [vmem:[%s610_s26 + $0x38] sm:$0xff] %v323_v41  ;;  %v256_v53 = vmul.f32 %v472_v45, %v583_v0  ;;  %v257_v54 = vmul.f32 %v475_v46, %v583_v0  ;;  %v258_v55 = vmul.f32 %v476_v47, %v583_v0  ;;  %v484_v17 = vunpack.c.h.bf16 %v520_v3  ;;  %v524_v40 = vld [vmem:[%s578_s18 + $0x60] sm:$0xff]   ;;  %v525_v41 = vld [vmem:[%s578_s18 + $0x68] sm:$0xff]  }
  0x1b   : > { %v259_v56 = vmul.f32 %v479_v48, %v583_v0  ;;  %v260_v57 = vmul.f32 %v480_v49, %v583_v0  ;;  %v292_v58 = vadd.f32 %v592_v9, %v253_v50  ;;  %v293_v59 = vadd.f32 %v592_v9, %v254_v51  ;;  %v526_v46 = vld [vmem:[%s578_s18 + $0x70] sm:$0xff]   ;;  %v527_v47 = vld [vmem:[%s578_s18 + $0x78] sm:$0xff]  }
  0x1c   : > { %v294_v60 = vadd.f32 %v592_v9, %v255_v52  ;;  %v295_v61 = vadd.f32 %v592_v9, %v256_v53  ;;  %v296_v62 = vadd.f32 %v592_v9, %v257_v54  ;;  %v297_v63 = vadd.f32 %v592_v9, %v258_v55 }
  0x1d   : > { %v298_v1 = vadd.f32 %v592_v9, %v259_v56  ;;  %v299_v2 = vadd.f32 %v592_v9, %v260_v57  ;;  %v324_v5 = vmax.f32 %v292_v58, 0.0  ;;  %v325_v6 = vmax.f32 %v293_v59, 0.0 }
  0x1e   : > { %v326_v7 = vmax.f32 %v294_v60, 0.0  ;;  %v327_v8 = vmax.f32 %v295_v61, 0.0  ;;  %v328_v12 = vmax.f32 %v296_v62, 0.0  ;;  %v329_v13 = vmax.f32 %v297_v63, 0.0 }
  0x1f   : > { %v330_v14 = vmax.f32 %v298_v1, 0.0  ;;  %v331_v15 = vmax.f32 %v299_v2, 0.0  ;;  %356 = vst [vmem:[%s610_s26 + $0x40] sm:$0xff] %v324_v5  ;;  %357 = vst [vmem:[%s610_s26 + $0x48] sm:$0xff] %v325_v6  ;;  %v487_v18 = vunpack.c.l.bf16 %v521_v4  ;;  %v488_v19 = vunpack.c.h.bf16 %v521_v4 }
  0x20   : > { %358 = vst [vmem:[%s610_s26 + $0x50] sm:$0xff] %v326_v7  ;;  %359 = vst [vmem:[%s610_s26 + $0x58] sm:$0xff] %v327_v8  ;;  %v491_v20 = vunpack.c.l.bf16 %v522_v10  ;;  %v492_v21 = vunpack.c.h.bf16 %v522_v10  ;;  %v495_v22 = vunpack.c.l.bf16 %v523_v11  ;;  %v496_v23 = vunpack.c.h.bf16 %v523_v11 }
  0x21   : > { %360 = vst [vmem:[%s610_s26 + $0x60] sm:$0xff] %v328_v12  ;;  %361 = vst [vmem:[%s610_s26 + $0x68] sm:$0xff] %v329_v13  ;;  %v261_v24 = vmul.f32 %v483_v16, %v583_v0  ;;  %v262_v25 = vmul.f32 %v484_v17, %v583_v0  ;;  %v263_v26 = vmul.f32 %v487_v18, %v583_v0  ;;  %v499_v52 = vunpack.c.l.bf16 %v524_v40 }
  0x22   : > { %362 = vst [vmem:[%s610_s26 + $0x70] sm:$0xff] %v330_v14  ;;  %363 = vst [vmem:[%s610_s26 + $0x78] sm:$0xff] %v331_v15  ;;  %v264_v27 = vmul.f32 %v488_v19, %v583_v0  ;;  %v265_v28 = vmul.f32 %v491_v20, %v583_v0  ;;  %v266_v29 = vmul.f32 %v492_v21, %v583_v0  ;;  %v500_v53 = vunpack.c.h.bf16 %v524_v40 }
  0x23   : > { %v267_v30 = vmul.f32 %v495_v22, %v583_v0  ;;  %v268_v31 = vmul.f32 %v496_v23, %v583_v0  ;;  %v300_v32 = vadd.f32 %v592_v9, %v261_v24  ;;  %v301_v33 = vadd.f32 %v592_v9, %v262_v25 }
  0x24   : > { %v302_v34 = vadd.f32 %v592_v9, %v263_v26  ;;  %v303_v35 = vadd.f32 %v592_v9, %v264_v27  ;;  %v304_v36 = vadd.f32 %v592_v9, %v265_v28  ;;  %v305_v37 = vadd.f32 %v592_v9, %v266_v29 }
  0x25   : > { %v306_v38 = vadd.f32 %v592_v9, %v267_v30  ;;  %v307_v39 = vadd.f32 %v592_v9, %v268_v31  ;;  %v332_v42 = vmax.f32 %v300_v32, 0.0  ;;  %v333_v43 = vmax.f32 %v301_v33, 0.0 }
  0x26   : > { %v334_v44 = vmax.f32 %v302_v34, 0.0  ;;  %v335_v45 = vmax.f32 %v303_v35, 0.0  ;;  %v336_v48 = vmax.f32 %v304_v36, 0.0  ;;  %v337_v49 = vmax.f32 %v305_v37, 0.0 }
  0x27   : > { %v338_v50 = vmax.f32 %v306_v38, 0.0  ;;  %v339_v51 = vmax.f32 %v307_v39, 0.0  ;;  %364 = vst [vmem:[%s610_s26 + $0x80] sm:$0xff] %v332_v42  ;;  %365 = vst [vmem:[%s610_s26 + $0x88] sm:$0xff] %v333_v43  ;;  %v503_v54 = vunpack.c.l.bf16 %v525_v41  ;;  %v504_v55 = vunpack.c.h.bf16 %v525_v41 }
  0x28   : > { %366 = vst [vmem:[%s610_s26 + $0x90] sm:$0xff] %v334_v44  ;;  %367 = vst [vmem:[%s610_s26 + $0x98] sm:$0xff] %v335_v45  ;;  %v507_v56 = vunpack.c.l.bf16 %v526_v46  ;;  %v508_v57 = vunpack.c.h.bf16 %v526_v46  ;;  %v511_v58 = vunpack.c.l.bf16 %v527_v47  ;;  %v512_v59 = vunpack.c.h.bf16 %v527_v47 }
  0x29   : > { %368 = vst [vmem:[%s610_s26 + $0xa0] sm:$0xff] %v336_v48  ;;  %369 = vst [vmem:[%s610_s26 + $0xa8] sm:$0xff] %v337_v49  ;;  %v269_v60 = vmul.f32 %v499_v52, %v583_v0  ;;  %v270_v61 = vmul.f32 %v500_v53, %v583_v0  ;;  %v271_v62 = vmul.f32 %v503_v54, %v583_v0 }
  0x2a   : > { %370 = vst [vmem:[%s610_s26 + $0xb0] sm:$0xff] %v338_v50  ;;  %371 = vst [vmem:[%s610_s26 + $0xb8] sm:$0xff] %v339_v51  ;;  %v272_v63 = vmul.f32 %v504_v55, %v583_v0  ;;  %v273_v1 = vmul.f32 %v507_v56, %v583_v0  ;;  %v274_v2 = vmul.f32 %v508_v57, %v583_v0 }
  0x2b   : > { %v275_v3 = vmul.f32 %v511_v58, %v583_v0  ;;  %v276_v4 = vmul.f32 %v512_v59, %v583_v0  ;;  %v308_v5 = vadd.f32 %v592_v9, %v269_v60  ;;  %v309_v6 = vadd.f32 %v592_v9, %v270_v61 }
  0x2c   : > { %v310_v7 = vadd.f32 %v592_v9, %v271_v62  ;;  %v311_v8 = vadd.f32 %v592_v9, %v272_v63  ;;  %v312_v10 = vadd.f32 %v592_v9, %v273_v1  ;;  %v313_v11 = vadd.f32 %v592_v9, %v274_v2 }
  0x2d   : > { %v314_v0 = vadd.f32 %v592_v9, %v275_v3  ;;  %v315_v12 = vadd.f32 %v592_v9, %v276_v4  ;;  %v340_v13 = vmax.f32 %v308_v5, 0.0  ;;  %v341_v14 = vmax.f32 %v309_v6, 0.0 }
  0x2e   : > { %v342_v15 = vmax.f32 %v310_v7, 0.0  ;;  %v343_v16 = vmax.f32 %v311_v8, 0.0  ;;  %v344_v17 = vmax.f32 %v312_v10, 0.0  ;;  %v345_v18 = vmax.f32 %v313_v11, 0.0 }
  0x2f   : > { %v346_v19 = vmax.f32 %v314_v0, 0.0  ;;  %v347_v20 = vmax.f32 %v315_v12, 0.0  ;;  %372 = vst [vmem:[%s610_s26 + $0xc0] sm:$0xff] %v340_v13  ;;  %373 = vst [vmem:[%s610_s26 + $0xc8] sm:$0xff] %v341_v14 }
  0x30   : > { %374 = vst [vmem:[%s610_s26 + $0xd0] sm:$0xff] %v342_v15  ;;  %375 = vst [vmem:[%s610_s26 + $0xd8] sm:$0xff] %v343_v16 }
  0x31   : > { %376 = vst [vmem:[%s610_s26 + $0xe0] sm:$0xff] %v344_v17  ;;  %377 = vst [vmem:[%s610_s26 + $0xe8] sm:$0xff] %v345_v18 }
  0x32   : > { %378 = vst [vmem:[%s610_s26 + $0xf0] sm:$0xff] %v346_v19  ;;  %379 = vst [vmem:[%s610_s26 + $0xf8] sm:$0xff] %v347_v20 }
  0x33 PF: > { %s13_s12 = sadd.s32 1, %s542_s12  }
  0x34   : > { %p10_p4 = scmp.ge.s32.totalorder %s13_s12, 4  }
  0x36   :  { %12 = sbr.rel (!%p10_p4) target bundleno = 1 (0x1), region = 62 }

// kernel: deconv2d_batchnorm_relu.2
= control target key start
LH: loop header
LB: loop body
LE: loop exit
PB: predicated region body
PF: predicated region fallthrough
CT: control target
= control target key end

     0   :  { %s1216_s12 = smov 0   ;;  %s1381_s0 = inlined_call_operand.vmem [shape: bf16[512,36], index: 0, kind: input, shape index: {}]   ;;  %s1382_s1 = inlined_call_operand.vmem [shape: bf16[36,128], index: 1, kind: input, shape index: {}]   ;;  %s1383_s2 = inlined_call_operand.vmem [shape: bf16[512,128], index: 2, kind: output, shape index: {0}]   ;;  %s1384_s3 = inlined_call_operand.vmem [shape: f32[16,128], index: 3, kind: output, shape index: {1}]  }
   0x1 LB: > { %s1222_s13 = sadd.s32 4294967295, %s1194_s12   ;;  %p894_p0 = scmp.ge.s32.totalorder %s1194_s12, 1  ;;  %s1194_s12 = sphi %s1216_s12, %s14_s12  }
   0x2   : > { %p141_p1 = scmp.lt.s32.totalorder %s1194_s12, 3 }
   0x4   : > { %p142_p2 = pnand %p894_p0, %p141_p1 }
   0x5   : > { %s895_s18 = sshll.u32 (!%p142_p2), %s1222_s13, 5  ;;  %p181_p4 = scmp.lt.s32.totalorder (!%p142_p2), %s1222_s13, 1 }
   0x6   : > { %145 = sbr.rel (%p142_p2) target bundleno = 301 (0x12d), region = 28  ;;  %p170_p3 = scmp.lt.s32.totalorder (!%p142_p2), %s895_s18, 63 }
   0xb   : > { %v1169_v0 = vld [vmem:[%s1382_s1 + $0x10] ss:$0 sps:$4 sm:$0x33]   ;;  %vm367_vm0 = vcmask 1041408   ;;  %v1170_v1 = vld [vmem:[%s1382_s1 + $0x8] sm:$0xff]   ;;  %v1171_v3 = vld [vmem:[%s1382_s1] sm:$0xff]  }
   0xc   : > { %1159 = vmatprep.subr.msk.bf16.mxu0 %vm367_vm0, %v1169_v0  ;;  %v369_v2 = vsel %vm367_vm0, %v1169_v0, 0  ;;  %1160 = vmatprep.subr.msk.bf16.mxu1 %vm367_vm0, %v1169_v0  ;;  %s1386_s18 = smov (!%p170_p3, %s895_s18), 63  ;;  %vm318_vm1 = vcmask 293888   ;;  %s1388_s13 = smov (!%p181_p4, %s1222_s13), 1 }
   0xd   : > { %1116 = vmatpush3.bf16.msra.mxu0 %v369_v2  ;;  %1156 = vmatpush3.bf16.msra.mxu1 %v369_v2  ;;  %s896_s21 = sshll.u32 %s1386_s18, 2  ;;  %s899_s28 = sshll.u32 %s1388_s13, 3 }
   0xe   : > { %1117 = vmatprep.subr.bf16.mxu0 %v1170_v1  ;;  %1154 = vmatprep.subr.bf16.mxu1 %v1170_v1  ;;  %s1244_s24 = scalar_lea.vmem %s1381_s0, %s896_s21  ;;  %s1283_s27 = scalar_lea.vmem %s1383_s2, %s896_s21 }
   0xf   : > { %v1172_v4 = vld [vmem:[%s1244_s24] sm:$0xff]   ;;  %v1173_v5 = vld [vmem:[%s1244_s24 + $0x8] sm:$0xff]   ;;  %v1174_v6 = vld [vmem:[%s1244_s24 + $0x10] sm:$0xff]   ;;  %s184_s4 = scalar_lea.vmem %s1384_s3, %s899_s28 }
  0x10   : > { %1121 = vmatprep.mubr.msk.bf16.mxu0 %vm318_vm1, %v1172_v4  ;;  %v1175_v7 = vld [vmem:[%s1244_s24 + $0x18] sm:$0xff]   ;;  %v1176_v8 = vld [vmem:[%s1244_s24 + $0x20] sm:$0xff]   ;;  %v1181_v10 = vld [vmem:[%s1244_s24 + $0x48] sm:$0xff]  }
  0x11   : > { %1118 = vmatpush3.bf16.msra.mxu0 %v1170_v1  ;;  %1157 = vmatpush3.bf16.msra.mxu1 %v1170_v1  ;;  %v1180_v9 = vld [vmem:[%s1244_s24 + $0x40] sm:$0xff]   ;;  %v1182_v11 = vld [vmem:[%s1244_s24 + $0x50] sm:$0xff]   ;;  %v1183_v12 = vld [vmem:[%s1244_s24 + $0x58] sm:$0xff]  }
  0x12   : > { %1119 = vmatprep.subr.bf16.mxu0 %v1171_v3  ;;  %1155 = vmatprep.subr.bf16.mxu1 %v1171_v3  ;;  %v1184_v13 = vld [vmem:[%s1244_s24 + $0x60] sm:$0xff]   ;;  %v1177_v14 = vld [vmem:[%s1244_s24 + $0x28] sm:$0xff]   ;;  %v1178_v15 = vld [vmem:[%s1244_s24 + $0x30] sm:$0xff]  }
  0x13   : > { %1137 = vmatprep.mubr.msk.bf16.mxu1 %vm318_vm1, %v1180_v9  ;;  %v1185_v16 = vld [vmem:[%s1244_s24 + $0x68] sm:$0xff]   ;;  %v1186_v17 = vld [vmem:[%s1244_s24 + $0x70] sm:$0xff]   ;;  %v1179_v18 = vld [vmem:[%s1244_s24 + $0x38] sm:$0xff]  }
  0x14   : > { %v1187_v19 = vld [vmem:[%s1244_s24 + $0x78] sm:$0xff]  }
  0x15   : > { %1120 = vmatpush3.bf16.msra.mxu0 %v1171_v3  ;;  %1158 = vmatpush3.bf16.msra.mxu1 %v1171_v3 }
  0x18   : > { %1122 = vmatmul.mubr.msk.bf16.vlgmr.msra.gmra.mxu0 %vm318_vm1, %v1173_v5  ;;  %1138 = vmatmul.mubr.msk.bf16.vlgmr.msra.gmra.mxu1 %vm318_vm1, %v1181_v10 }
  0x19   : > { %1125 = vmatprep.mubr.msk.bf16.mxu0 %vm318_vm1, %v1174_v6  ;;  %1141 = vmatprep.mubr.msk.bf16.mxu1 %vm318_vm1, %v1182_v11 }
  0x20   : > { %1126 = vmatmul.mubr.msk.bf16.gmra.mxu0 %vm318_vm1, %v1175_v7  ;;  %1142 = vmatmul.mubr.msk.bf16.gmra.mxu1 %vm318_vm1, %v1183_v12 }
  0x21   : > { %1129 = vmatprep.mubr.msk.bf16.mxu0 %vm318_vm1, %v1176_v8  ;;  %1145 = vmatprep.mubr.msk.bf16.mxu1 %vm318_vm1, %v1184_v13 }
  0x28   : > { %1130 = vmatmul.mubr.msk.bf16.gmra.mxu0 %vm318_vm1, %v1177_v14  ;;  %1146 = vmatmul.mubr.msk.bf16.gmra.mxu1 %vm318_vm1, %v1185_v16 }
  0x29   : > { %1133 = vmatprep.mubr.msk.bf16.mxu0 %vm318_vm1, %v1178_v15  ;;  %1149 = vmatprep.mubr.msk.bf16.mxu1 %vm318_vm1, %v1186_v17 }
  0x30   : > { %1134 = vmatmul.mubr.msk.bf16.gmra.mxu0 %vm318_vm1, %v1179_v18  ;;  %1150 = vmatmul.mubr.msk.bf16.gmra.mxu1 %vm318_vm1, %v1187_v19 }
  0xd8   : > { %v1123_v20 = vpop.f32.mrf.mxu0  ;;  %v1285_v25 = vpop.f32.mrf.mxu1 }
  0xd9   : > { %v731_v32 = vmul.f32 %v1123_v20, %v1123_v20 }
  0xda   : > { %v405_v21 = vpop.f32.mrf.mxu0  ;;  %v1288_v31 = vpop.f32.mrf.mxu1 }
  0xdb   : > { %v729_v26 = vmul.f32 %v405_v21, %v405_v21 }
  0xdc   : > { %v1124_v22 = vpop.f32.mrf.mxu0  ;;  %v1291_v36 = vpop.f32.mrf.mxu1 }
  0xdd   : > { %v1009_v23 = vpack.c.bf16 %v1124_v22, %v1123_v20  ;;  %v732_v37 = vmul.f32 %v1124_v22, %v1124_v22  ;;  %v1049_v40 = vpack.c.bf16 %v1291_v36, %v1285_v25 }
  0xde   : > { %v408_v24 = vpop.f32.mrf.mxu0  ;;  %v1295_v42 = vpop.f32.mrf.mxu1 }
  0xdf   : > { %1081 = vst [vmem:[%s1283_s27 + $0x8] sm:$0xff] %v1009_v23   ;;  %v1004_v27 = vpack.c.bf16 %v408_v24, %v405_v21  ;;  %v692_v28 = vadd.f32 %v408_v24, %v405_v21  ;;  %v730_v29 = vmul.f32 %v408_v24, %v408_v24  ;;  %1089 = vst [vmem:[%s1283_s27 + $0x48] sm:$0xff] %v1049_v40  }
  0xe0   : > { %v1127_v30 = vpop.f32.mrf.mxu0  ;;  %v1044_v48 = vpack.c.bf16 %v1295_v42, %v1288_v31  ;;  %v1300_v49 = vpop.f32.mrf.mxu1 }
  0xe1   : > { %1005 = vst [vmem:[%s1283_s27] sm:$0xff] %v1004_v27   ;;  %v693_v33 = vadd.f32 %v1123_v20, %v692_v28  ;;  %v761_v34 = vadd.f32 %v730_v29, %v729_v26  ;;  %v735_v56 = vmul.f32 %v1127_v30, %v1127_v30 }
  0xe2   : > { %v421_v35 = vpop.f32.mrf.mxu0  ;;  %1088 = vst [vmem:[%s1283_s27 + $0x40] sm:$0xff] %v1044_v48   ;;  %v1304_v55 = vpop.f32.mrf.mxu1 }
  0xe3   : > { %v762_v38 = vadd.f32 %v761_v34, %v731_v32  ;;  %v694_v39 = vadd.f32 %v1124_v22, %v693_v33  ;;  %v733_v44 = vmul.f32 %v421_v35, %v421_v35 }
  0xe4   : > { %v1128_v41 = vpop.f32.mrf.mxu0  ;;  %v1307_v60 = vpop.f32.mrf.mxu1 }
  0xe5   : > { %v695_v43 = vadd.f32 %v694_v39, %v421_v35  ;;  %v763_v45 = vadd.f32 %v762_v38, %v732_v37  ;;  %v1019_v46 = vpack.c.bf16 %v1128_v41, %v1127_v30  ;;  %v736_v61 = vmul.f32 %v1128_v41, %v1128_v41 }
  0xe6   : > { %v424_v47 = vpop.f32.mrf.mxu0  ;;  %v1059_v0 = vpack.c.bf16 %v1307_v60, %v1300_v49  ;;  %v1311_v2 = vpop.f32.mrf.mxu1 }
  0xe7   : > { %v764_v50 = vadd.f32 %v763_v45, %v733_v44  ;;  %1083 = vst [vmem:[%s1283_s27 + $0x18] sm:$0xff] %v1019_v46   ;;  %v1014_v51 = vpack.c.bf16 %v424_v47, %v421_v35  ;;  %v696_v52 = vadd.f32 %v695_v43, %v424_v47  ;;  %v734_v53 = vmul.f32 %v424_v47, %v424_v47 }
  0xe8   : > { %v1131_v54 = vpop.f32.mrf.mxu0  ;;  %1091 = vst [vmem:[%s1283_s27 + $0x58] sm:$0xff] %v1059_v0   ;;  %v1054_v8 = vpack.c.bf16 %v1311_v2, %v1304_v55  ;;  %v1316_v9 = vpop.f32.mrf.mxu1 }
  0xe9   : > { %1082 = vst [vmem:[%s1283_s27 + $0x10] sm:$0xff] %v1014_v51   ;;  %v697_v57 = vadd.f32 %v1127_v30, %v696_v52  ;;  %v765_v58 = vadd.f32 %v764_v50, %v734_v53  ;;  %v739_v16 = vmul.f32 %v1131_v54, %v1131_v54  ;;  %v745_v53 = vmul.f32 %v1288_v31, %v1288_v31 }
  0xea   : > { %v437_v59 = vpop.f32.mrf.mxu0  ;;  %1090 = vst [vmem:[%s1283_s27 + $0x50] sm:$0xff] %v1054_v8   ;;  %v1320_v15 = vpop.f32.mrf.mxu1  ;;  %v750_v8 = vmul.f32 %v1311_v2, %v1311_v2 }
  0xeb   : > { %v766_v62 = vadd.f32 %v765_v58, %v735_v56  ;;  %v698_v63 = vadd.f32 %v1128_v41, %v697_v57  ;;  %v737_v4 = vmul.f32 %v437_v59, %v437_v59 }
  0xec   : > { %v1132_v1 = vpop.f32.mrf.mxu0  ;;  %v1323_v20 = vpop.f32.mrf.mxu1 }
  0xed   : > { %v699_v3 = vadd.f32 %v698_v63, %v437_v59  ;;  %v767_v5 = vadd.f32 %v766_v62, %v736_v61  ;;  %v1029_v6 = vpack.c.bf16 %v1132_v1, %v1131_v54  ;;  %v740_v21 = vmul.f32 %v1132_v1, %v1132_v1 }
  0xee   : > { %v440_v7 = vpop.f32.mrf.mxu0  ;;  %v1069_v24 = vpack.c.bf16 %v1323_v20, %v1316_v9  ;;  %v504_v27 = vpop.f32.mrf.mxu1  ;;  %v747_v62 = vmul.f32 %v1285_v25, %v1285_v25 }
  0xef   : > { %v768_v10 = vadd.f32 %v767_v5, %v737_v4  ;;  %1085 = vst [vmem:[%s1283_s27 + $0x28] sm:$0xff] %v1029_v6   ;;  %v1024_v11 = vpack.c.bf16 %v440_v7, %v437_v59  ;;  %v700_v12 = vadd.f32 %v699_v3, %v440_v7  ;;  %v738_v13 = vmul.f32 %v440_v7, %v440_v7 }
  0xf0   : > { %v1135_v14 = vpop.f32.mrf.mxu0  ;;  %1093 = vst [vmem:[%s1283_s27 + $0x68] sm:$0xff] %v1069_v24   ;;  %v1064_v34 = vpack.c.bf16 %v504_v27, %v1320_v15  ;;  %v1329_v35 = vpop.f32.mrf.mxu1  ;;  %v746_v59 = vmul.f32 %v1295_v42, %v1295_v42  ;;  %v749_v5 = vmul.f32 %v1304_v55, %v1304_v55 }
  0xf1   : > { %1084 = vst [vmem:[%s1283_s27 + $0x20] sm:$0xff] %v1024_v11   ;;  %v701_v17 = vadd.f32 %v1131_v54, %v700_v12  ;;  %v769_v18 = vadd.f32 %v768_v10, %v738_v13  ;;  %v743_v43 = vmul.f32 %v1135_v14, %v1135_v14 }
  0xf2   : > { %v453_v19 = vpop.f32.mrf.mxu0  ;;  %1092 = vst [vmem:[%s1283_s27 + $0x60] sm:$0xff] %v1064_v34   ;;  %v517_v41 = vpop.f32.mrf.mxu1 }
  0xf3   : > { %v770_v22 = vadd.f32 %v769_v18, %v739_v16  ;;  %v702_v23 = vadd.f32 %v1132_v1, %v701_v17  ;;  %v741_v29 = vmul.f32 %v453_v19, %v453_v19  ;;  %v748_v1 = vmul.f32 %v1291_v36, %v1291_v36 }
  0xf4   : > { %v1136_v26 = vpop.f32.mrf.mxu0  ;;  %v1152_v46 = vpop.f32.mrf.mxu1  ;;  %v754_v18 = vmul.f32 %v504_v27, %v504_v27 }
  0xf5   : > { %v703_v28 = vadd.f32 %v702_v23, %v453_v19  ;;  %v771_v30 = vadd.f32 %v770_v22, %v740_v21  ;;  %v1039_v32 = vpack.c.bf16 %v1136_v26, %v1135_v14  ;;  %v744_v47 = vmul.f32 %v1136_v26, %v1136_v26 }
  0xf6   : > { %v456_v33 = vpop.f32.mrf.mxu0  ;;  %v1079_v51 = vpack.c.bf16 %v1152_v46, %v1329_v35  ;;  %v520_v52 = vpop.f32.mrf.mxu1  ;;  %v756_v22 = vmul.f32 %v1323_v20, %v1323_v20 }
  0xf7   : > { %v772_v37 = vadd.f32 %v771_v30, %v741_v29  ;;  %1087 = vst [vmem:[%s1283_s27 + $0x38] sm:$0xff] %v1039_v32   ;;  %v1034_v38 = vpack.c.bf16 %v456_v33, %v453_v19  ;;  %v704_v39 = vadd.f32 %v703_v28, %v456_v33  ;;  %v742_v40 = vmul.f32 %v456_v33, %v456_v33 }
  0xf8   : > { %1095 = vst [vmem:[%s1283_s27 + $0x78] sm:$0xff] %v1079_v51   ;;  %v1074_v57 = vpack.c.bf16 %v520_v52, %v517_v41  ;;  %v755_v19 = vmul.f32 %v1316_v9, %v1316_v9  ;;  %v759_v30 = vmul.f32 %v1329_v35, %v1329_v35  ;;  %v760_v33 = vmul.f32 %v1152_v46, %v1152_v46 }
  0xf9   : > { %1086 = vst [vmem:[%s1283_s27 + $0x30] sm:$0xff] %v1034_v38   ;;  %v705_v44 = vadd.f32 %v1135_v14, %v704_v39  ;;  %v773_v45 = vadd.f32 %v772_v37, %v742_v40  ;;  %v753_v14 = vmul.f32 %v1320_v15, %v1320_v15 }
  0xfa   : > { %1094 = vst [vmem:[%s1283_s27 + $0x70] sm:$0xff] %v1074_v57  }
  0xfb   : > { %v706_v48 = vadd.f32 %v1136_v26, %v705_v44  ;;  %v774_v50 = vadd.f32 %v773_v45, %v743_v43  ;;  %v757_v26 = vmul.f32 %v517_v41, %v517_v41 }
  0xfd   : > { %v775_v54 = vadd.f32 %v774_v50, %v744_v47  ;;  %v707_v56 = vadd.f32 %v706_v48, %v1288_v31 }
  0xff   : > { %v708_v58 = vadd.f32 %v707_v56, %v1295_v42  ;;  %v776_v61 = vadd.f32 %v775_v54, %v745_v53 }
 0x101   : > { %v709_v63 = vadd.f32 %v1285_v25, %v708_v58  ;;  %v777_v0 = vadd.f32 %v776_v61, %v746_v59  ;;  %v751_v25 = vmul.f32 %v1300_v49, %v1300_v49 }
 0x103   : > { %v778_v3 = vadd.f32 %v777_v0, %v747_v62  ;;  %v710_v31 = vadd.f32 %v1291_v36, %v709_v63  ;;  %v752_v36 = vmul.f32 %v1307_v60, %v1307_v60 }
 0x105   : > { %v711_v4 = vadd.f32 %v710_v31, %v1304_v55  ;;  %v779_v42 = vadd.f32 %v778_v3, %v748_v1 }
 0x107   : > { %v780_v6 = vadd.f32 %v779_v42, %v749_v5  ;;  %v712_v7 = vadd.f32 %v711_v4, %v1311_v2 }
 0x109   : > { %v713_v10 = vadd.f32 %v1300_v49, %v712_v7  ;;  %v781_v11 = vadd.f32 %v780_v6, %v750_v8 }
 0x10b   : > { %v782_v12 = vadd.f32 %v781_v11, %v751_v25  ;;  %v714_v13 = vadd.f32 %v1307_v60, %v713_v10 }
 0x10d   : > { %v715_v55 = vadd.f32 %v714_v13, %v1320_v15  ;;  %v783_v16 = vadd.f32 %v782_v12, %v752_v36 }
 0x10f   : > { %v784_v17 = vadd.f32 %v783_v16, %v753_v14  ;;  %v716_v2 = vadd.f32 %v715_v55, %v504_v27  ;;  %v758_v27 = vmul.f32 %v520_v52, %v520_v52 }
 0x111   : > { %v717_v49 = vadd.f32 %v1316_v9, %v716_v2  ;;  %v785_v21 = vadd.f32 %v784_v17, %v754_v18 }
 0x113   : > { %v786_v23 = vadd.f32 %v785_v21, %v755_v19  ;;  %v718_v60 = vadd.f32 %v1323_v20, %v717_v49 }
 0x115   : > { %v719_v24 = vadd.f32 %v718_v60, %v517_v41  ;;  %v787_v15 = vadd.f32 %v786_v23, %v756_v22  ;;  %v798_v41 = vlaneseq }
 0x117   : > { %v788_v28 = vadd.f32 %v787_v15, %v757_v26  ;;  %v720_v29 = vadd.f32 %v719_v24, %v520_v52  ;;  %v799_v48 = vshrl.u32 %v798_v41, 7 }
 0x119   : > { %v721_v9 = vadd.f32 %v1329_v35, %v720_v29  ;;  %v789_v32 = vadd.f32 %v788_v28, %v758_v27  ;;  %vm800_vm2 = vcmp.lt.s32.totalorder %v799_v48, 4 }
 0x11b   : > { %v722_v34 = vadd.f32 %v1152_v46, %v721_v9  ;;  %v790_v37 = vadd.f32 %v789_v32, %v759_v30 }
 0x11d   : > { %v723_v38 = vrot.slane %v722_v34, 4  ;;  %v791_v39 = vadd.f32 %v790_v37, %v760_v33 }
 0x11f   : > { %v724_v20 = vadd.f32 %v723_v38, %v722_v34  ;;  %v792_v40 = vrot.slane %v791_v39, 4 }
 0x121   : > { %v725_v43 = vrot.slane %v724_v20, 2  ;;  %v793_v44 = vadd.f32 %v792_v40, %v791_v39 }
 0x123   : > { %v726_v45 = vadd.f32 %v725_v43, %v724_v20  ;;  %v794_v47 = vrot.slane %v793_v44, 2 }
 0x125   : > { %v727_v50 = vrot.slane %v726_v45, 1  ;;  %v795_v51 = vadd.f32 %v794_v47, %v793_v44 }
 0x127   : > { %v796_v35 = vrot.slane %v795_v51, 1  ;;  %v728_v46 = vadd.f32 %v727_v50, %v726_v45 }
 0x129   : > { %v797_v52 = vadd.f32 %v796_v35, %v795_v51 }
 0x12b   : > { %v801_v53 = vsel %vm800_vm2, %v728_v46, %v797_v52 }
 0x12c   : > { %802 = vst [vmem:[%s184_s4] sm:$0xff] %v801_v53 }
 0x12d PF: > { %s14_s12 = sadd.s32 1, %s1194_s12  }
 0x12e   : > { %p11_p5 = scmp.ge.s32.totalorder %s14_s12, 4  }
 0x130   :  { %13 = sbr.rel (!%p11_p5) target bundleno = 1 (0x1), region = 70 }

</bundles_post_ra>
